<compile_context>
chip_gen: v5e
topology: v5e:2x2
jax: 0.10.0
libtpu: 0.0.40
codegen_flags: <defaults>
</compile_context>

<pallas_src>
import jax
import jax.numpy as jnp
from jax.experimental import pallas as pl
from jax.experimental.pallas import tpu as pltpu

DIM = 10            # hidden dim of the GIN MLPs (module default dim=10)
NUM_LAYERS = 5
FPAD = 128          # lane-dense padded feature/hidden dim

# Packed bf16 weight slab [NUM_LAYERS, W_ROWS, FPAD]:
#   rows [0,128)   : w1 (zero-padded to [128,128])
#   rows [128,256) : w2 (zero-padded to [128,128])
W_ROWS = 2 * FPAD
# Packed f32 "small" slab [NUM_LAYERS, S_ROWS, FPAD]:
#   row 0 : b1,  row 1 : b2,  row 2 : readout_k / N   (rest zero)
S_ROWS = 8


def netgin_kernel(a_ref, x_ref, w_ref, s_ref, out_ref, x_sc, acc_sc):
    k = pl.program_id(0)

    @pl.when(k == 0)
    def _():
        x_sc[...] = x_ref[...].astype(jnp.float32)      # padded lanes are zero
        acc_sc[...] = jnp.zeros_like(acc_sc)

    a = a_ref[...]                                      # [N, N] bf16, includes +I
    x = x_sc[...]                                       # [N, FPAD] f32
    w1 = w_ref[0, 0:FPAD, :]                            # [FPAD, FPAD] bf16
    w2 = w_ref[0, FPAD:2 * FPAD, :]                     # [FPAD, FPAD] bf16
    b1 = s_ref[0, 0:1, :]                               # [1, FPAD] f32
    b2 = s_ref[0, 1:2, :]                               # [1, FPAD] f32
    ro = s_ref[0, 2:3, :]                               # [1, FPAD] f32, = l_k / N

    # GINConv 'sum' with eps=0 folded into A:  z = (A + I) @ x
    z = jnp.dot(a, x.astype(jnp.bfloat16), preferred_element_type=jnp.float32)
    # MLP = Linear -> ReLU -> Linear   (bf16 MXU inputs, f32 accumulation/VPU)
    y = jnp.maximum(
        jnp.dot(z.astype(jnp.bfloat16), w1, preferred_element_type=jnp.float32) + b1,
        0.0)
    y = jnp.dot(y.astype(jnp.bfloat16), w2, preferred_element_type=jnp.float32) + b2
    # F.relu applied to the conv output in NetGIN.forward
    x_new = jnp.maximum(y, 0.0)

    x_sc[...] = x_new
    # dgl.mean_nodes + l_k readout folded: ro is pre-scaled by 1/N on the host,
    # accumulate x * ro and do a single reduce after the last layer.
    acc_sc[...] = acc_sc[...] + x_new * ro

    @pl.when(k == NUM_LAYERS - 1)
    def _():
        s = jnp.sum(acc_sc[...], axis=0, keepdims=True)     # [1, FPAD]
        s = jnp.sum(s, axis=1, keepdims=True)                # [1, 1]
        sig = 1.0 / (1.0 + jnp.exp(-s))                      # torch.sigmoid
        # Lane-dense full-tile store; wrapper slices out [1, 1].
        out_ref[...] = jnp.broadcast_to(sig, out_ref.shape)


def netgin_forward(adj, h, layers, readout):
    """adj: [N, N] float32 (no self loops); h: [N, F_in];
    layers: 5 x (w1 [F_in|DIM, DIM], b1 [DIM], w2 [DIM, DIM], b2 [DIM]);
    readout: 5 x [DIM] (Linear(dim, 1, bias=False) weights)."""
    N, f_in = h.shape

    # Fold the eps=0 GIN residual into the adjacency: z = (A + I) @ h.
    a_hat = (adj + jnp.eye(N, dtype=jnp.float32)).astype(jnp.bfloat16)

    # Zero-pad node features to a lane-dense [N, FPAD] layout once (exact:
    # padded weight rows/cols and biases are zero, so padded lanes stay zero).
    x0 = jnp.zeros((N, FPAD), jnp.float32).at[:, :f_in].set(h).astype(jnp.bfloat16)

    # Pack weights into one bf16 slab and biases + (readout/N) into one f32 slab.
    wslab = jnp.zeros((NUM_LAYERS, W_ROWS, FPAD), jnp.float32)
    sslab = jnp.zeros((NUM_LAYERS, S_ROWS, FPAD), jnp.float32)
    for k, (w1, b1, w2, b2) in enumerate(layers):
        wslab = wslab.at[k, :w1.shape[0], :w1.shape[1]].set(w1)
        wslab = wslab.at[k, FPAD:FPAD + w2.shape[0], :w2.shape[1]].set(w2)
        sslab = sslab.at[k, 0, :b1.shape[-1]].set(b1.reshape(-1))
        sslab = sslab.at[k, 1, :b2.shape[-1]].set(b2.reshape(-1))
        sslab = sslab.at[k, 2, :readout[k].shape[-1]].set(
            readout[k].reshape(-1) / float(N))
    wslab = wslab.astype(jnp.bfloat16)

    flops = NUM_LAYERS * (2 * N * N * FPAD + 2 * 2 * N * FPAD * FPAD)
    bytes_accessed = (2 * (a_hat.size + x0.size + wslab.size)
                      + 4 * (sslab.size + 8 * FPAD))

    out = pl.pallas_call(
        netgin_kernel,
        out_shape=jax.ShapeDtypeStruct((8, FPAD), jnp.float32),
        grid_spec=pltpu.PrefetchScalarGridSpec(
            num_scalar_prefetch=0,
            grid=(NUM_LAYERS,),
            in_specs=[
                pl.BlockSpec((N, N), lambda k: (0, 0)),              # A + I (bf16)
                pl.BlockSpec((N, FPAD), lambda k: (0, 0)),           # x0 (bf16)
                pl.BlockSpec((1, W_ROWS, FPAD), lambda k: (k, 0, 0)),  # per-layer weights
                pl.BlockSpec((1, S_ROWS, FPAD), lambda k: (k, 0, 0)),  # per-layer b1/b2/ro
            ],
            out_specs=pl.BlockSpec((8, FPAD), lambda k: (0, 0)),
            scratch_shapes=[
                pltpu.VMEM((N, FPAD), jnp.float32),   # carried node features
                pltpu.VMEM((N, FPAD), jnp.float32),   # readout accumulator
            ],
        ),
        compiler_params=pltpu.CompilerParams(
            dimension_semantics=("arbitrary",),
            vmem_limit_bytes=2 * 1024 * 1024,
        ),
        cost_estimate=pl.CostEstimate(
            flops=flops, transcendentals=1, bytes_accessed=bytes_accessed),
    )(a_hat, x0, wslab, sslab)

    return out[0:1, 0:1]   # [1, 1], matches torch.sigmoid(x) for a single graph


if __name__ == "__main__":
    # Single small graph (dgl.mean_nodes over one graph == mean over its nodes).
    N, F_IN = 16, 4
    key = jax.random.PRNGKey(0)
    keys = iter(jax.random.split(key, 64))

    # Deterministic random undirected adjacency without self-loops.
    adj = (jax.random.uniform(next(keys), (N, N)) < 0.3).astype(jnp.float32)
    adj = jnp.maximum(adj, adj.T) * (1.0 - jnp.eye(N, dtype=jnp.float32))

    h = jax.random.normal(next(keys), (N, F_IN), jnp.float32)

    # Deterministic parameter init (shapes match the PyTorch module).
    layers = []
    in_dim = F_IN
    for _ in range(NUM_LAYERS):
        w1 = jax.random.normal(next(keys), (in_dim, DIM), jnp.float32) * 0.2
        b1 = jax.random.normal(next(keys), (DIM,), jnp.float32) * 0.1
        w2 = jax.random.normal(next(keys), (DIM, DIM), jnp.float32) * 0.2
        b2 = jax.random.normal(next(keys), (DIM,), jnp.float32) * 0.1
        layers.append((w1, b1, w2, b2))
        in_dim = DIM
    readout = [jax.random.normal(next(keys), (DIM,), jnp.float32) * 0.2
               for _ in range(NUM_LAYERS)]

    out = netgin_forward(adj, h, layers, readout)
    jax.block_until_ready(out)
    assert out.shape == (1, 1)

    # Reference in plain JAX, mimicking the kernel's bf16 MXU operands with f32
    # accumulation (same math as the PyTorch module; bf16-matched tolerance).
    bf16 = jnp.bfloat16
    a_hat_f = adj + jnp.eye(N, dtype=jnp.float32)
    x = h
    s_ref = jnp.zeros((), jnp.float32)
    for k in range(NUM_LAYERS):
        w1, b1, w2, b2 = layers[k]
        z = jnp.dot(a_hat_f.astype(bf16), x.astype(bf16),
                    preferred_element_type=jnp.float32)
        y = jnp.maximum(
            jnp.dot(z.astype(bf16), w1.astype(bf16),
                    preferred_element_type=jnp.float32) + b1, 0.0)
        y = jnp.dot(y.astype(bf16), w2.astype(bf16),
                    preferred_element_type=jnp.float32) + b2
        x = jnp.maximum(y, 0.0)
        s_ref = s_ref + jnp.mean(x, axis=0) @ readout[k]
    ref = 1.0 / (1.0 + jnp.exp(-s_ref))

    # Looser check vs a pure-f32 reference would also pass (~1e-2); here we
    # compare against the bf16-MXU-matched reference.
    assert jnp.allclose(out[0, 0], ref, atol=5e-3), (out, ref)

    print("KERNEL_OK")
</pallas_src>

<mosaic_0001>
module attributes {stable_mosaic.version = 11 : i64} {
  func.func @netgin_kernel(%arg0: i32, %arg1: memref<16x16xbf16, #tpu.memory_space<vmem>>, %arg2: memref<16x128xbf16, #tpu.memory_space<vmem>>, %arg3: memref<1x256x128xbf16, #tpu.memory_space<vmem>>, %arg4: memref<1x8x128xf32, #tpu.memory_space<vmem>>, %arg5: memref<8x128xf32, #tpu.memory_space<vmem>>, %arg6: memref<16x128xf32, #tpu.memory_space<vmem>>, %arg7: memref<16x128xf32, #tpu.memory_space<vmem>>) attributes {dimension_semantics = [#tpu.dimension_semantics<arbitrary>], iteration_bounds = array<i64: 5>, scalar_prefetch = 0 : i64, scratch_operands = 2 : i64, tpu.core_type = #tpu.core_type<tc>, window_params = [{pipeline_mode = #tpu.pipeline_mode<synchronous>, transform_indices = @transform_0, window_bounds = array<i64: 16, 16>}, {pipeline_mode = #tpu.pipeline_mode<synchronous>, transform_indices = @transform_1, window_bounds = array<i64: 16, 128>}, {transform_indices = @transform_2, window_bounds = array<i64: 1, 256, 128>}, {transform_indices = @transform_3, window_bounds = array<i64: 1, 8, 128>}, {pipeline_mode = #tpu.pipeline_mode<synchronous>, transform_indices = @transform_4, window_bounds = array<i64: 8, 128>}]} {
    %c0_i32 = arith.constant 0 : i32
    %0 = arith.cmpi eq, %arg0, %c0_i32 : i32
    %1 = arith.extui %0 : i1 to i32
    %c0_i32_0 = arith.constant 0 : i32
    %2 = arith.cmpi ne, %1, %c0_i32_0 : i32
    scf.if %2 {
      %c0_27 = arith.constant 0 : index
      %c0_28 = arith.constant 0 : index
      %38 = vector.load %arg2[%c0_27, %c0_28] : memref<16x128xbf16, #tpu.memory_space<vmem>>, vector<16x128xbf16>
      %39 = arith.extf %38 : vector<16x128xbf16> to vector<16x128xf32>
      %c0_29 = arith.constant 0 : index
      %c0_30 = arith.constant 0 : index
      %40 = vector.load %arg6[%c0_29, %c0_30] : memref<16x128xf32, #tpu.memory_space<vmem>>, vector<16x128xf32>
      tpu.vector_store %arg6[%c0_29, %c0_30], %39 {strides = array<i32>} : memref<16x128xf32, #tpu.memory_space<vmem>>, vector<16x128xf32>,
      %cst_31 = arith.constant 0.000000e+00 : f32
      %41 = vector.broadcast %cst_31 : f32 to vector<16x128xf32>
      %c0_32 = arith.constant 0 : index
      %c0_33 = arith.constant 0 : index
      %42 = vector.load %arg7[%c0_32, %c0_33] : memref<16x128xf32, #tpu.memory_space<vmem>>, vector<16x128xf32>
      tpu.vector_store %arg7[%c0_32, %c0_33], %41 {strides = array<i32>} : memref<16x128xf32, #tpu.memory_space<vmem>>, vector<16x128xf32>,
    } else {
    }
    %c0 = arith.constant 0 : index
    %c0_1 = arith.constant 0 : index
    %3 = vector.load %arg1[%c0, %c0_1] : memref<16x16xbf16, #tpu.memory_space<vmem>>, vector<16x16xbf16>
    %c0_2 = arith.constant 0 : index
    %c0_3 = arith.constant 0 : index
    %4 = vector.load %arg6[%c0_2, %c0_3] : memref<16x128xf32, #tpu.memory_space<vmem>>, vector<16x128xf32>
    %c0_4 = arith.constant 0 : index
    %c0_5 = arith.constant 0 : index
    %c0_6 = arith.constant 0 : index
    %5 = vector.load %arg3[%c0_4, %c0_5, %c0_6] : memref<1x256x128xbf16, #tpu.memory_space<vmem>>, vector<1x128x128xbf16>
    %6 = vector.shape_cast %5 : vector<1x128x128xbf16> to vector<128x128xbf16>
    %c0_7 = arith.constant 0 : index
    %c128 = arith.constant 128 : index
    %c0_8 = arith.constant 0 : index
    %7 = vector.load %arg3[%c0_7, %c128, %c0_8] : memref<1x256x128xbf16, #tpu.memory_space<vmem>>, vector<1x128x128xbf16>
    %8 = vector.shape_cast %7 : vector<1x128x128xbf16> to vector<128x128xbf16>
    %c0_9 = arith.constant 0 : index
    %c0_10 = arith.constant 0 : index
    %c0_11 = arith.constant 0 : index
    %9 = vector.load %arg4[%c0_9, %c0_10, %c0_11] : memref<1x8x128xf32, #tpu.memory_space<vmem>>, vector<1x1x128xf32>
    %10 = vector.shape_cast %9 : vector<1x1x128xf32> to vector<1x128xf32>
    %c0_12 = arith.constant 0 : index
    %c1 = arith.constant 1 : index
    %c0_13 = arith.constant 0 : index
    %11 = vector.load %arg4[%c0_12, %c1, %c0_13] : memref<1x8x128xf32, #tpu.memory_space<vmem>>, vector<1x1x128xf32>
    %12 = vector.shape_cast %11 : vector<1x1x128xf32> to vector<1x128xf32>
    %c0_14 = arith.constant 0 : index
    %c2 = arith.constant 2 : index
    %c0_15 = arith.constant 0 : index
    %13 = vector.load %arg4[%c0_14, %c2, %c0_15] : memref<1x8x128xf32, #tpu.memory_space<vmem>>, vector<1x1x128xf32>
    %14 = vector.shape_cast %13 : vector<1x1x128xf32> to vector<1x128xf32>
    %15 = arith.truncf %4 : vector<16x128xf32> to vector<16x128xbf16>
    %cst = arith.constant dense<0.000000e+00> : vector<16x128xf32>
    %16 = tpu.matmul %3, %15, %cst {dimension_numbers = #tpu.dot_dimension_numbers<[1], [0], [0], [1], [0, 0, 1, 1], [], []>} : vector<16x16xbf16>, vector<16x128xbf16>, vector<16x128xf32> -> vector<16x128xf32>
    %17 = arith.truncf %16 : vector<16x128xf32> to vector<16x128xbf16>
    %cst_16 = arith.constant dense<0.000000e+00> : vector<16x128xf32>
    %18 = tpu.matmul %17, %6, %cst_16 {dimension_numbers = #tpu.dot_dimension_numbers<[1], [0], [0], [1], [0, 0, 1, 1], [], []>} : vector<16x128xbf16>, vector<128x128xbf16>, vector<16x128xf32> -> vector<16x128xf32>
    %19 = vector.broadcast %10 : vector<1x128xf32> to vector<16x128xf32>
    %20 = arith.addf %18, %19 : vector<16x128xf32>
    %cst_17 = arith.constant 0.000000e+00 : f32
    %21 = vector.broadcast %cst_17 : f32 to vector<16x128xf32>
    %22 = arith.maximumf %20, %21 : vector<16x128xf32>
    %23 = arith.truncf %22 : vector<16x128xf32> to vector<16x128xbf16>
    %cst_18 = arith.constant dense<0.000000e+00> : vector<16x128xf32>
    %24 = tpu.matmul %23, %8, %cst_18 {dimension_numbers = #tpu.dot_dimension_numbers<[1], [0], [0], [1], [0, 0, 1, 1], [], []>} : vector<16x128xbf16>, vector<128x128xbf16>, vector<16x128xf32> -> vector<16x128xf32>
    %25 = vector.broadcast %12 : vector<1x128xf32> to vector<16x128xf32>
    %26 = arith.addf %24, %25 : vector<16x128xf32>
    %cst_19 = arith.constant 0.000000e+00 : f32
    %27 = vector.broadcast %cst_19 : f32 to vector<16x128xf32>
    %28 = arith.maximumf %26, %27 : vector<16x128xf32>
    %c0_20 = arith.constant 0 : index
    %c0_21 = arith.constant 0 : index
    %29 = vector.load %arg6[%c0_20, %c0_21] : memref<16x128xf32, #tpu.memory_space<vmem>>, vector<16x128xf32>
    tpu.vector_store %arg6[%c0_20, %c0_21], %28 {strides = array<i32>} : memref<16x128xf32, #tpu.memory_space<vmem>>, vector<16x128xf32>,
    %c0_22 = arith.constant 0 : index
    %c0_23 = arith.constant 0 : index
    %30 = vector.load %arg7[%c0_22, %c0_23] : memref<16x128xf32, #tpu.memory_space<vmem>>, vector<16x128xf32>
    %31 = vector.broadcast %14 : vector<1x128xf32> to vector<16x128xf32>
    %32 = arith.mulf %28, %31 : vector<16x128xf32>
    %33 = arith.addf %30, %32 : vector<16x128xf32>
    %c0_24 = arith.constant 0 : index
    %c0_25 = arith.constant 0 : index
    %34 = vector.load %arg7[%c0_24, %c0_25] : memref<16x128xf32, #tpu.memory_space<vmem>>, vector<16x128xf32>
    tpu.vector_store %arg7[%c0_24, %c0_25], %33 {strides = array<i32>} : memref<16x128xf32, #tpu.memory_space<vmem>>, vector<16x128xf32>,
    %c4_i32 = arith.constant 4 : i32
    %35 = arith.cmpi eq, %arg0, %c4_i32 : i32
    %36 = arith.extui %35 : i1 to i32
    %c0_i32_26 = arith.constant 0 : i32
    %37 = arith.cmpi ne, %36, %c0_i32_26 : i32
    scf.if %37 {
      %c0_27 = arith.constant 0 : index
      %c0_28 = arith.constant 0 : index
      %38 = vector.load %arg7[%c0_27, %c0_28] : memref<16x128xf32, #tpu.memory_space<vmem>>, vector<16x128xf32>
      %cst_29 = arith.constant dense<0.000000e+00> : vector<128xf32>
      %39 = vector.multi_reduction <add>, %38, %cst_29 [0] : vector<16x128xf32> to vector<128xf32>
      %40 = vector.shape_cast %39 : vector<128xf32> to vector<1x128xf32>
      %cst_30 = arith.constant dense<0.000000e+00> : vector<1xf32>
      %41 = vector.multi_reduction <add>, %40, %cst_30 [1] : vector<1x128xf32> to vector<1xf32>
      %42 = vector.shape_cast %41 : vector<1xf32> to vector<1x1xf32>
      %cst_31 = arith.constant 0.000000e+00 : f32
      %43 = vector.broadcast %cst_31 : f32 to vector<1x1xf32>
      %44 = arith.subf %43, %42 : vector<1x1xf32>
      %45 = math.exp %44 : vector<1x1xf32>
      %cst_32 = arith.constant 1.000000e+00 : f32
      %46 = vector.broadcast %cst_32 : f32 to vector<1x1xf32>
      %47 = arith.addf %46, %45 : vector<1x1xf32>
      %cst_33 = arith.constant 1.000000e+00 : f32
      %48 = vector.broadcast %cst_33 : f32 to vector<1x1xf32>
      %49 = arith.divf %48, %47 : vector<1x1xf32>
      %50 = vector.shape_cast %49 : vector<1x1xf32> to vector<1x1xf32>
      %51 = vector.broadcast %50 : vector<1x1xf32> to vector<8x128xf32>
      %c0_34 = arith.constant 0 : index
      %c0_35 = arith.constant 0 : index
      %52 = vector.load %arg5[%c0_34, %c0_35] : memref<8x128xf32, #tpu.memory_space<vmem>>, vector<8x128xf32>
      tpu.vector_store %arg5[%c0_34, %c0_35], %51 {strides = array<i32>} : memref<8x128xf32, #tpu.memory_space<vmem>>, vector<8x128xf32>,
    } else {
    }
    return
  }
  func.func @transform_0(%arg0: i32) -> (i32, i32) {
    %c0_i32 = arith.constant 0 : i32
    %c0_i32_0 = arith.constant 0 : i32
    %c0_i32_1 = arith.constant 0 : i32
    return %c0_i32, %c0_i32_0 : i32, i32
  }
  func.func @transform_1(%arg0: i32) -> (i32, i32) {
    %c0_i32 = arith.constant 0 : i32
    %c0_i32_0 = arith.constant 0 : i32
    %c0_i32_1 = arith.constant 0 : i32
    return %c0_i32, %c0_i32_0 : i32, i32
  }
  func.func @transform_2(%arg0: i32) -> (i32, i32, i32) {
    %c0_i32 = arith.constant 0 : i32
    %c0_i32_0 = arith.constant 0 : i32
    %c0_i32_1 = arith.constant 0 : i32
    return %arg0, %c0_i32, %c0_i32_0 : i32, i32, i32
  }
  func.func @transform_3(%arg0: i32) -> (i32, i32, i32) {
    %c0_i32 = arith.constant 0 : i32
    %c0_i32_0 = arith.constant 0 : i32
    %c0_i32_1 = arith.constant 0 : i32
    return %arg0, %c0_i32, %c0_i32_0 : i32, i32, i32
  }
  func.func @transform_4(%arg0: i32) -> (i32, i32) {
    %c0_i32 = arith.constant 0 : i32
    %c0_i32_0 = arith.constant 0 : i32
    %c0_i32_1 = arith.constant 0 : i32
    return %c0_i32, %c0_i32_0 : i32, i32
  }
}

</mosaic_0001>

<bundles_post_ra>
// kernel: tpu_custom_call.1
= control target key start
LH: loop header
LB: loop body
LE: loop exit
PB: predicated region body
PF: predicated region fallthrough
CT: control target
= control target key end

     0   :  { %s1229_s0 = inlined_call_operand.hbm [shape: bf16[16,16], index: 0, kind: input, shape index: {}]   ;;  %s1230_s1 = inlined_call_operand.hbm [shape: bf16[16,128], index: 1, kind: input, shape index: {}]   ;;  %s1231_s2 = inlined_call_operand.hbm [shape: bf16[5,256,128], index: 2, kind: input, shape index: {}]   ;;  %s1232_s3 = inlined_call_operand.hbm [shape: f32[5,8,128], index: 3, kind: input, shape index: {}]   ;;  %s1233_s4 = inlined_call_operand.hbm [shape: f32[8,128], index: 4, kind: output, shape index: {}]  }
   0x1   :  { %1235 = sst [smem:[#allocation16_spill]] %s1229_s0 }
   0x2   :  { %9 = vsyncpa [#allocation5], 0 }
   0x3   :  { %10 = vsyncpa [#allocation8], 0 }
   0x4   :  { %11 = vsyncpa [#allocation6], 0  ;;  %s1046_s15 = smov 0   ;;  %s1048_s16 = smov 0  }
   0x5   :  { %s1050_s17 = smov 0   ;;  %s1052_s18 = smov 0  }
   0x6 LB: > { %s1065_s19 = sadd.s32 4294967295, %s1013_s18   ;;  %p79_p0 = scmp.ne.s32.totalorder %s1005_s16, %s1001_s15  ;;  %s1013_s18 = sphi %s1052_s18, %s1245_s18   ;;  %s1009_s17 = sphi %s1050_s17, %s1244_s17   ;;  %s1005_s16 = sphi %s1048_s16, %s1243_s16   ;;  %s1001_s15 = sphi %s1046_s15, %s1242_s15  }
   0x7   : > { %p80_p1 = scmp.eq.s32.totalorder %s1065_s19, 0  ;;  %p626_p2 = scmp.ge.s32.totalorder %s1013_s18, 1 }
   0x8   : > { %p137_p3 = scmp.lt.s32.totalorder %s1013_s18, 6  ;;  %p627_p4 = scmp.ne.s32.totalorder %s1065_s19, 0 }
   0x9   : > { %p1074_p5 = por %p80_p1, %p79_p0  ;;  %s1237_s0 = sld [smem:[#allocation16_spill]] }
   0xa   : > { %p1081_p6 = pnand %p626_p2, %p137_p3  ;;  %s1015_s25 = smov [#allocation4]  }
   0xb   : > { %s150_s26 = sshll.u32 %s1015_s25, 4  ;;  %s1094_s28 = sadd.s32 1, %s1013_s18   ;;  %s151_s26 = int_to_ptr.vmem [resolvable:$true] %s150_s26 }
   0xc   : > { %p753_p7 = pneg %p1081_p6  ;;  %s1016_s29 = smov 64  }
   0xd   : > { %s1017_s30 = smov 4   ;;  %s63_s5 = ssub.s32 %s1013_s18, %s1094_s28 }
   0xe   : > { %p1089_p8 = pnand %p753_p7, %p80_p1  ;;  %s66_s6 = sadd.s32 1, %s1009_s17 }
   0xf   : > { %s148_s23 = sshll.u32 %s1237_s0, 4  ;;  %p64_p9 = scmp.eq.s32.totalorder %s63_s5, 0  ;;  %s149_s23 = int_to_ptr.hbm [resolvable:$true] %s148_s23 }
  0x10   : > { %756 = dma.hbm_to_vmem [thread:$0]  (!%p1089_p8), %s149_s23, 128, %s151_s26, [#allocation5], %s1016_s29, %s1016_s29, %s1017_s30  }
  0x11   : > { %p73_p10 = scmp.ne.s32.totalorder %s1009_s17, %s1005_s16  ;;  %p74_p11 = scmp.eq.s32.totalorder %s1013_s18, 0 }
  0x12   : > { %p769_p12 = scmp.lt.s32.totalorder %s1013_s18, 5  ;;  %s178_s8 = sand.u32 1, %s1013_s18  }
  0x13   : > { %s1109_s7 = scalar_select %p64_p9, %s1009_s17, %s66_s6  }
  0x14   : > { %p75_p13 = por %p74_p11, %p73_p10  ;;  %s1234_s9 = sand.u32 1, %s1009_s17  }
  0x15   : > { %s630_s10 = sshll.u32 %s1234_s9, 7  ;;  %s715_s11 = sshll.u32 %s1013_s18, 7 }
  0x16   : > { %s187_s14 = scalar_lea.hbm %s1231_s2, %s715_s11  ;;  %s182_s21 = scalar_lea.vmem [#allocation9], %s630_s10 }
  0x17   : > { %s188_s15 = sshll.u32 %s187_s14, 4  ;;  %s190_s22 = sshll.u32 %s182_s21, 4  ;;  %s189_s15 = int_to_ptr.hbm [resolvable:$true] %s188_s15  ;;  %s191_s22 = int_to_ptr.vmem [resolvable:$true] %s190_s22 }
  0x18   : > { %p1121_p0 = pnand %p769_p12, %p75_p13  ;;  %s162_s5 = sshll.u32 %s1230_s1, 4  ;;  %s163_s5 = int_to_ptr.hbm [resolvable:$true] %s162_s5 }
  0x19   : > { %s1018_s6 = smov [#allocation7]   ;;  %s1128_s11 = scalar_lea.sflag [#allocation5], %s178_s8 }
  0x1a   : > { %s164_s12 = sshll.u32 %s1018_s6, 4  ;;  %s849_s10 = sshra.s32 %s189_s15, 4  ;;  %s850_s10 = int_to_ptr.hbm [resolvable:$true] %s849_s10  ;;  %s165_s12 = int_to_ptr.vmem [resolvable:$true] %s164_s12 }
  0x1b   : > { %s851_s13 = scalar_lea.hbm %s850_s10, 128  ;;  %p853_p3 = pneg %p1121_p0 }
  0x1c   : > { %p852_p2 = scmp.ne.s32.totalorder %s850_s10, %s851_s13  ;;  %s856_s25 = scalar_lea.hbm %s1231_s2, 640 }
  0x1d   : > { %p857_p10 = scmp.lt.s32.totalorder %s850_s10, %s1231_s2  ;;  %p858_p11 = scmp.lt.s32.totalorder %s856_s25, %s851_s13 }
  0x1e   : > { %p854_p7 = pnand %p853_p3, %p852_p2 }
  0x1f   : > { %p859_p12 = por %p858_p11, %p857_p10 }
  0x20   : > { %p855_p9 = pneg %p854_p7 }
  0x22   : > { %p860_p13 = pnand %p859_p12, %p855_p9 }
  0x24   : > { %863 = shalt.err (!%p860_p13)
}
  0x25   : > { %763 = dma.hbm_to_vmem [thread:$0]  (!%p1121_p0), %s189_s15, 2048, %s191_s22, %s1128_s11, %s1016_s29, %s1016_s29, %s1017_s30  }
  0x26   : > { %s1241_s8 = sand.u32 1, %s1009_s17   ;;  %s634_s9 = sshll.u32 %s1013_s18, 3 }
  0x27   : > { %s633_s6 = sshll.u32 %s1241_s8, 3  ;;  %s208_s14 = scalar_lea.hbm %s1232_s3, %s634_s9 }
  0x28   : > { %759 = dma.hbm_to_vmem [thread:$0]  (!%p1089_p8), %s163_s5, 128, %s165_s12, [#allocation8], %s1016_s29, %s1016_s29, %s1017_s30  }
  0x29   : > { %s204_s21 = scalar_lea.vmem [#allocation10], %s633_s6  ;;  %s210_s26 = sshll.u32 %s208_s14, 4  ;;  %s211_s26 = int_to_ptr.hbm [resolvable:$true] %s210_s26 }
  0x2a   : > { %s212_s25 = sshll.u32 %s204_s21, 4  ;;  %s909_s0 = sshra.s32 %s211_s26, 4  ;;  %s213_s25 = int_to_ptr.vmem [resolvable:$true] %s212_s25  ;;  %s910_s0 = int_to_ptr.hbm [resolvable:$true] %s909_s0 }
  0x2b   : > { %s911_s15 = scalar_lea.hbm %s910_s0, 8  ;;  %s916_s18 = scalar_lea.hbm %s1232_s3, 40 }
  0x2c   : > { %p912_p2 = scmp.ne.s32.totalorder %s910_s0, %s911_s15  ;;  %p917_p8 = scmp.lt.s32.totalorder %s910_s0, %s1232_s3 }
  0x2d   : > { %p918_p10 = scmp.lt.s32.totalorder %s916_s18, %s911_s15 }
  0x2e   : > { %p914_p7 = pnand %p912_p2, %p853_p3 }
  0x2f   : > { %p919_p11 = por %p918_p10, %p917_p8 }
  0x30   : > { %p915_p9 = pneg %p914_p7 }
  0x32   : > { %p920_p12 = pnand %p919_p11, %p915_p9 }
  0x34   : > { %923 = shalt.err (!%p920_p12)
}
  0x35   : > { %766 = dma.hbm_to_vmem [thread:$0]  (!%p1121_p0), %s211_s26, 128, %s213_s25, %s1128_s11  }
  0x36   : > { %221 = sbr.rel (%p1081_p6) target bundleno = 686 (0x2ae), region = 36 }
  0x3b   : > { %984 = dma.done.wait (%p80_p1), [#allocation5], 128  }
  0x3c   : > { %986 = vsyncadd (%p80_p1), [#allocation5], 4294967168 }
  0x3d   : > { %988 = dma.done.wait (%p80_p1), [#allocation8], 128  }
  0x3e   : > { %990 = vsyncadd (%p80_p1), [#allocation8], 4294967168  ;;  %s233_s0 = sand.u32 1, %s1065_s19   ;;  %s235_s23 = sand.u32 1, %s1005_s16  }
  0x3f   : > { %s638_s5 = sshll.u32 %s235_s23, 7  ;;  %s234_s24 = scalar_lea.sflag [#allocation5], %s233_s0 }
  0x40   : > { %s1182_s12 = scalar_lea.vmem [#allocation9], %s638_s5 }
  0x41   : > { %992 = dma.done.wait (%p1074_p5), %s234_s24, 2176  }
  0x42   : > { %994 = vsyncadd (%p1074_p5), %s234_s24, 4294965120  ;;  %s639_s11 = sshll.u32 %s235_s23, 3  ;;  %277 = sbr.rel (%p627_p4) target bundleno = 76 (0x4c), region = 56 }
  0x43   : > { %s1188_s8 = scalar_lea.vmem [#allocation10], %s639_s11 }
  0x47   : > { %v734_v0 = vld [vmem:[#allocation7] sm:$0xff]   ;;  %v1019_v3 = vmov 0.0  }
  0x48   : > { %v735_v1 = vunpack.c.l.bf16 %v734_v0  ;;  %v736_v2 = vunpack.c.h.bf16 %v734_v0  ;;  %284 = vst [vmem:[#allocation3 + $0x8] sm:$0xff] %v1019_v3 }
  0x49   : > { %285 = vst [vmem:[#allocation3] sm:$0xff] %v1019_v3 }
  0x4a   : > { %282 = vst [vmem:[#allocation2] sm:$0xff] %v735_v1 }
  0x4b   : > { %283 = vst [vmem:[#allocation2 + $0x8] sm:$0xff] %v736_v2 }
  0x4c PF: > { %v724_v7 = vld [vmem:[%s1182_s12 + $0x38] sm:$0xff]  ;;  %v716_v8 = vld [vmem:[#allocation4] sm:$0xff]  ;;  %vm331_vm0 = vcmask 130048   ;;  %v722_v10 = vld [vmem:[%s1182_s12 + $0x28] sm:$0xff]  ;;  %p710_p1 = scmp.ne.s32.totalorder %s1065_s19, 4 }
  0x4d   : > { %399 = vmatpush.bf16.msra.mxu1 %v724_v7  ;;  %v723_v9 = vld [vmem:[%s1182_s12 + $0x30] sm:$0xff]  ;;  %v721_v11 = vld [vmem:[%s1182_s12 + $0x20] sm:$0xff]  ;;  %v720_v12 = vld [vmem:[%s1182_s12 + $0x18] sm:$0xff] }
  0x4e   : > { %v719_v13 = vld [vmem:[%s1182_s12 + $0x10] sm:$0xff]  ;;  %v718_v14 = vld [vmem:[%s1182_s12 + $0x8] sm:$0xff]  ;;  %v717_v15 = vld [vmem:[%s1182_s12] sm:$0xff] }
  0x4f   : > { %v732_v16 = vld [vmem:[%s1182_s12 + $0x78] sm:$0xff]  ;;  %v731_v17 = vld [vmem:[%s1182_s12 + $0x70] sm:$0xff]  ;;  %v730_v18 = vld [vmem:[%s1182_s12 + $0x68] sm:$0xff] }
  0x50   : > { %465 = vmatpush.bf16.msra.mxu2 %v732_v16  ;;  %v729_v19 = vld [vmem:[%s1182_s12 + $0x60] sm:$0xff]  ;;  %v728_v23 = vld [vmem:[%s1182_s12 + $0x58] sm:$0xff]  ;;  %v727_v24 = vld [vmem:[%s1182_s12 + $0x50] sm:$0xff] }
  0x51   : > { %v288_v4 = vld [vmem:[#allocation2] sm:$0xff]  ;;  %400 = vmatpush.bf16.msra.mxu1 %v723_v9  ;;  %v726_v25 = vld [vmem:[%s1182_s12 + $0x48] sm:$0xff]  ;;  %v725_v26 = vld [vmem:[%s1182_s12 + $0x40] sm:$0xff] }
  0x52   : > { %v289_v5 = vld [vmem:[#allocation2 + $0x8] sm:$0xff]  ;;  %v812_v28 = vld [vmem:[%s1188_s8] ss:$0 sm:$0xff]  ;;  %v813_v35 = vld [vmem:[%s1188_s8 + $0x1] ss:$0 sm:$0xff] }
  0x53   : > { %v325_v6 = vpack.c.bf16 %v289_v5, %v288_v4  ;;  %v814_v38 = vld [vmem:[%s1188_s8 + $0x2] ss:$0 sm:$0xff] }
  0x54   : > { %466 = vmatpush.bf16.msra.mxu2 %v731_v17  ;;  %v483_v40 = vld [vmem:[#allocation3 + $0x8] sm:$0xff]  ;;  %v484_v46 = vld [vmem:[#allocation3] sm:$0xff] }
  0x55   : > { %342 = vmatpush.bf16.msra.mxu0 %v325_v6  ;;  %401 = vmatpush.bf16.msra.mxu1 %v722_v10 }
  0x58   : > { %645 = vmatmul.msk.bf16.vlgmr.msra.gmra.mxu0 %vm331_vm0, %v716_v8  ;;  %467 = vmatpush.bf16.msra.mxu2 %v730_v18 }
  0x59   : > { %402 = vmatpush.bf16.msra.mxu1 %v721_v11 }
  0x5c   : > { %468 = vmatpush.bf16.msra.mxu2 %v729_v19 }
  0x5d   : > { %403 = vmatpush.bf16.msra.mxu1 %v720_v12 }
  0x60   : > { %469 = vmatpush.bf16.msra.mxu2 %v728_v23 }
  0x61   : > { %404 = vmatpush.bf16.msra.mxu1 %v719_v13 }
  0x64   : > { %470 = vmatpush.bf16.msra.mxu2 %v727_v24 }
  0x65   : > { %405 = vmatpush.bf16.msra.mxu1 %v718_v14 }
  0x68   : > { %471 = vmatpush.bf16.msra.mxu2 %v726_v25 }
  0x69   : > { %406 = vmatpush.bf16.msra.mxu1 %v717_v15 }
  0x6c   : > { %472 = vmatpush.bf16.msra.mxu2 %v725_v26 }
  0xd5   : > { %v344_v20 = vpop.f32.mrf.mxu0 }
  0xdd   : > { %v346_v21 = vpop.f32.mrf.mxu0 }
  0xde   : > { %v349_v22 = vpack.c.bf16 %v346_v21, %v344_v20 }
  0xe0   : > { %407 = vmatmul.bf16.vlgmr.msra.gmra.mxu1 %v349_v22 }
 0x15d   : > { %v408_v27 = vpop.f32.mrf.mxu1 }
 0x15e   : > { %v409_v29 = vadd.f32 %v812_v28, %v408_v27 }
 0x160   : > { %v413_v32 = vmax.f32 %v409_v29, 0.0 }
 0x165   : > { %v410_v30 = vpop.f32.mrf.mxu1 }
 0x166   : > { %v411_v31 = vadd.f32 %v812_v28, %v410_v30 }
 0x168   : > { %v414_v33 = vmax.f32 %v411_v31, 0.0 }
 0x16a   : > { %v415_v34 = vpack.c.bf16 %v414_v33, %v413_v32 }
 0x16c   : > { %473 = vmatmul.bf16.vlgmr.msra.gmra.mxu2 %v415_v34 }
 0x1ef   : > { %v474_v36 = vpop.f32.mrf.mxu2 }
 0x1f0   : > { %v475_v37 = vadd.f32 %v813_v35, %v474_v36 }
 0x1f2   : > { %v479_v39 = vmax.f32 %v475_v37, 0.0 }
 0x1f4   : > { %481 = vst [vmem:[#allocation2] sm:$0xff] %v479_v39  ;;  %v486_v41 = vmul.f32 %v814_v38, %v479_v39 }
 0x1f6   : > { %v488_v42 = vadd.f32 %v486_v41, %v483_v40 }
 0x1f7   : > { %v476_v43 = vpop.f32.mrf.mxu2 }
 0x1f8   : > { %490 = vst [vmem:[#allocation3 + $0x8] sm:$0xff] %v488_v42  ;;  %v477_v44 = vadd.f32 %v813_v35, %v476_v43 }
 0x1fa   : > { %v480_v45 = vmax.f32 %v477_v44, 0.0 }
 0x1fc   : > { %482 = vst [vmem:[#allocation2 + $0x8] sm:$0xff] %v480_v45  ;;  %v487_v47 = vmul.f32 %v814_v38, %v480_v45  ;;  %495 = sbr.rel (%p710_p1) target bundleno = 681 (0x2a9), region = 60 }
 0x1fe   : > { %v489_v48 = vadd.f32 %v487_v47, %v484_v46 }
 0x200   : > { %491 = vst [vmem:[#allocation3] sm:$0xff] %v489_v48 }
 0x201   : > { %v496_v49 = vld [vmem:[#allocation3 + $0x8] sm:$0xff] }
 0x207   : > { %v497_v50 = vld [vmem:[#allocation3] sm:$0xff] }
 0x208   : > { %v498_v51 = vadd.f32 %v497_v50, %v496_v49 }
 0x20a   : > { %v499_v52 = vrot.slane %v498_v51, 4 }
 0x20c   : > { %v500_v53 = vadd.f32 %v499_v52, %v498_v51 }
 0x20e   : > { %v501_v54 = vrot.slane %v500_v53, 2 }
 0x210   : > { %v502_v55 = vadd.f32 %v501_v54, %v500_v53 }
 0x212   : > { %v503_v56 = vrot.slane %v502_v55, 1 }
 0x214   : > { %v504_v57 = vadd.f32 %v503_v56, %v502_v55 }
 0x216   : > { %505 = vadd.xlane.f32.xlu0 %v504_v57 }
 0x289   : > { %v506_v58 = vpop.xlane.xlu0 %505 }
 0x28a   : > { %v507_v59 = vsub.f32 0.0, %v506_v58 }
 0x28c   : > { %v508_v60 = vmul.f32 1.442695, %v507_v59 }
 0x28e   : > { %815 = vpow2.f32 %v508_v60 }
 0x294   : > { %v816_v61 = vpop.eup %815 }
 0x295   : > { %v510_v62 = vadd.f32 1.0, %v816_v61 }
 0x297   : > { %817 = vrcp.f32 %v510_v62  ;;  %v522_v2 = vand.u32 2147483648, %v510_v62  ;;  %v520_v4 = vand.u32 2147483647, %v510_v62  ;;  %vm516_vm2 = vweird.f32 %v510_v62 }
 0x299   : > { %v523_v6 = vor.u32 1.1754944e-38, %v522_v2  ;;  %vm521_vm4 = vcmp.eq.f32.partialorder %v520_v4, 8.507059e+37 }
 0x29d   : > { %v818_v63 = vpop.eup %817 }
 0x29e   : > { %v512_v0 = vmul.f32 %v818_v63, %v510_v62  ;;  %vm517_vm1 = vweird.f32 %v818_v63 }
 0x29f   : > { %vm518_vm3 = vmor %vm516_vm2, %vm517_vm1 }
 0x2a0   : > { %v513_v1 = vsub.f32 1.0, %v512_v0 }
 0x2a2   : > { %v514_v3 = vmul.f32 %v818_v63, %v513_v1 }
 0x2a4   : > { %v515_v5 = vadd.f32 %v818_v63, %v514_v3 }
 0x2a6   : > { %v519_v7 = vsel %vm518_vm3, %v818_v63, %v515_v5 }
 0x2a7   : > { %v524_v8 = vsel %vm521_vm4, %v523_v6, %v519_v7 }
 0x2a8   : > { %526 = vst [vmem:[#allocation11] sm:$0xff] %v524_v8 }
 0x2a9 PF: > { %p772_p4 = scmp.eq.s32.totalorder %s1065_s19, 4  ;;  %s1020_s20 = smov [#allocation11]  }
 0x2aa   : > { %s533_s6 = sshll.u32 %s1020_s20, 4  ;;  %s535_s13 = sshll.u32 %s1233_s4, 4  ;;  %s534_s6 = int_to_ptr.vmem [resolvable:$true] %s533_s6  ;;  %s536_s13 = int_to_ptr.hbm [resolvable:$true] %s535_s13 }
 0x2ab   : > { %750 = dma.vmem_to_hbm [thread:$0]  (%p772_p4), %s534_s6, 128, %s536_s13, [#allocation6]  }
 0x2ac   : > { %996 = dma.done.wait (%p772_p4), [#allocation6], 128  }
 0x2ad   : > { %998 = vsyncadd (%p772_p4), [#allocation6], 4294967168 }
 0x2ae PF: > { %p14_p5 = scmp.ge.s32.totalorder %s1094_s28, 7   ;;  %s1242_s15 = smov %s1005_s16 }
 0x2af   : > { %s1243_s16 = smov %s1009_s17  ;;  %s1244_s17 = smov %s1109_s7 }
 0x2b0   : > { %s1245_s18 = smov %s1094_s28  ;;  %16 = sbr.rel (!%p14_p5) target bundleno = 6 (0x6), region = 99 }
 0x2b5   :  { %549 = vsyncpa [#allocation5], 1 }
 0x2b6   :  { %551 = vsyncpa [#allocation5 + $0x1], 1 }
 0x2b7   :  { %552 = vsyncpa [#allocation8], 1 }
 0x2b8   :  { %553 = vsyncpa [#allocation6], 1 }
 0x2b9   :  { %555 = vsyncpa [#allocation6 + $0x1], 1 }

</bundles_post_ra>
